<compile_context>
chip_gen: v7x
topology: tpu7x:2x2x1
jax: 0.10.0
libtpu: 0.0.40
codegen_flags: <defaults>
</compile_context>

<pallas_src>
import functools
import math

import jax
import jax.numpy as jnp
from jax.experimental import pallas as pl
from jax.experimental.pallas import tpu as pltpu

LN_EPS = 1e-5  # torch.nn.LayerNorm default


def _round_up(a: int, b: int) -> int:
    return (a + b - 1) // b * b


def _projection_kernel(x_ref, w1_ref, w2_ref, gamma_ref, beta_ref, o_ref, *, d_out):
    # x_ref:  (tm, d_in)          tile of input rows (native dtype)
    # w1_ref: (d_in, d_pad)       linear1 weight, pre-transposed, zero-padded cols
    # w2_ref: (d_pad, d_pad)      linear2 weight, pre-transposed, zero-padded
    # gamma_ref/beta_ref: (1, d_pad) LayerNorm affine params (zero-padded)
    # o_ref:  (tm, d_pad)
    x = x_ref[...]
    w1 = w1_ref[...]

    # linear1 — MXU in native dtype, f32 accumulation.
    e1 = jnp.dot(x, w1, preferred_element_type=jnp.float32)

    # exact (erf-based) GELU, matching torch.nn.functional.gelu default.
    # TODO(synk): tanh-approx GELU would move this to the EUP slot but changes numerics.
    h = 0.5 * e1 * (1.0 + jax.lax.erf(e1 * (1.0 / math.sqrt(2.0))))

    # linear2 accumulated directly into the residual (fewer live f32 tiles).
    # Dropout(p=0.5) omitted — module evaluated in eval() mode (identity).
    y = e1 + jnp.dot(h.astype(w2_ref.dtype), w2_ref[...],
                     preferred_element_type=jnp.float32)

    # LayerNorm over the real d_out features (padded columns of y are exact zeros).
    d_pad = y.shape[-1]
    inv_d = 1.0 / d_out
    mean = jnp.sum(y, axis=-1, keepdims=True) * inv_d
    centered = y - mean
    if d_pad != d_out:
        col = jax.lax.broadcasted_iota(jnp.int32, (1, d_pad), 1)
        centered = jnp.where(col < d_out, centered, 0.0)
    var = jnp.sum(centered * centered, axis=-1, keepdims=True) * inv_d
    norm = centered * jax.lax.rsqrt(var + LN_EPS)
    out = norm * gamma_ref[...].astype(jnp.float32) + beta_ref[...].astype(jnp.float32)

    o_ref[...] = out.astype(o_ref.dtype)


def projection_forward(x, w1_t, w2_t, gamma, beta, *, block_rows=256):
    """x: [..., d_in] -> [..., d_out].  w1_t: [d_in, d_out], w2_t: [d_out, d_out]."""
    d_in = x.shape[-1]
    d_out = w1_t.shape[1]
    lead_shape = x.shape[:-1]
    rows = math.prod(lead_shape) if lead_shape else 1
    x2d = x.reshape(rows, d_in)

    # ---- lane-dense output: pad feature axis to a multiple of 128 -------------
    d_pad = _round_up(d_out, 128)
    if d_pad != d_out:
        pad = d_pad - d_out
        w1_t = jnp.pad(w1_t, ((0, 0), (0, pad)))
        w2_t = jnp.pad(w2_t, ((0, pad), (0, pad)))
        gamma = jnp.pad(gamma, (0, pad))
        beta = jnp.pad(beta, (0, pad))
    gamma2d = gamma.reshape(1, d_pad)
    beta2d = beta.reshape(1, d_pad)

    # ---- row tiling (large tiles; clamp to problem size, multiple of 8) -------
    block_rows_eff = max(8, min(_round_up(block_rows, 8), _round_up(rows, 8)))

    # ---- VMEM budget: shrink the row tile if the plan would not fit -----------
    w_itemsize = w1_t.dtype.itemsize
    x_itemsize = x.dtype.itemsize
    bytes_weights = 2 * (w1_t.size + w2_t.size + gamma2d.size + beta2d.size) * w_itemsize

    def _tile_bytes(tm):
        io = 2 * (tm * d_in * x_itemsize + tm * d_pad * x_itemsize)  # double-buffered x/out tiles
        inter = 4 * tm * d_pad * 4                                    # f32 intermediates / spills
        return io + inter

    try:
        vmem_cap = pltpu.get_tpu_info().vmem_capacity_bytes
    except Exception:
        vmem_cap = 64 * 1024 * 1024  # conservative (v7x per-core)
    budget = int(vmem_cap * 0.75)    # leave headroom
    while block_rows_eff > 8 and bytes_weights + _tile_bytes(block_rows_eff) > budget:
        block_rows_eff = max(8, _round_up(block_rows_eff // 2, 8))

    rows_pad = _round_up(rows, block_rows_eff)
    if rows_pad != rows:
        x2d = jnp.pad(x2d, ((0, rows_pad - rows), (0, 0)))

    grid = (rows_pad // block_rows_eff,)
    vmem_limit = min(
        max(int((bytes_weights + _tile_bytes(block_rows_eff)) * 1.5), 32 * 1024 * 1024),
        budget,
    )

    kernel = functools.partial(_projection_kernel, d_out=d_out)
    out_shape = jax.ShapeDtypeStruct((rows_pad, d_pad), x.dtype)
    cparams = pltpu.CompilerParams(
        dimension_semantics=("parallel",),  # row axis shards across TCs (v7x megacore)
        vmem_limit_bytes=vmem_limit,
    )

    def _build_and_run(single_buffer_consts):
        def const_spec(shape):
            # W1/W2/gamma/beta never change block index -> one VMEM buffer suffices.
            if single_buffer_consts:
                return pl.BlockSpec(shape, lambda i: (0, 0),
                                    pipeline_mode=pl.Buffered(1))
            return pl.BlockSpec(shape, lambda i: (0, 0))

        return pl.pallas_call(
            kernel,
            out_shape=out_shape,
            grid_spec=pltpu.PrefetchScalarGridSpec(
                num_scalar_prefetch=0,
                grid=grid,
                in_specs=[
                    pl.BlockSpec((block_rows_eff, d_in), lambda i: (i, 0)),  # x tile
                    const_spec((d_in, d_pad)),                               # W1^T (full)
                    const_spec((d_pad, d_pad)),                              # W2^T (full)
                    const_spec((1, d_pad)),                                  # gamma
                    const_spec((1, d_pad)),                                  # beta
                ],
                out_specs=pl.BlockSpec((block_rows_eff, d_pad), lambda i: (i, 0)),
            ),
            compiler_params=cparams,
        )(x2d, w1_t, w2_t, gamma2d, beta2d)

    try:
        out2d = _build_and_run(True)
    except Exception:
        # Fallback if this JAX version rejects pipeline_mode / Buffered(1).
        out2d = _build_and_run(False)

    out2d = out2d[:rows, :d_out]
    return out2d.reshape(*lead_shape, d_out)


def _reference(x, w1_t, w2_t, gamma, beta):
    x32 = x.astype(jnp.float32)
    e1 = x32 @ w1_t.astype(jnp.float32)
    h = jax.nn.gelu(e1, approximate=False)
    e2 = h @ w2_t.astype(jnp.float32)
    y = e1 + e2
    mean = y.mean(-1, keepdims=True)
    var = ((y - mean) ** 2).mean(-1, keepdims=True)
    norm = (y - mean) * jax.lax.rsqrt(var + LN_EPS)
    return norm * gamma.astype(jnp.float32) + beta.astype(jnp.float32)


if __name__ == "__main__":
    # Small shapes consistent with the module: batch=2, seq=8, d_in=32, d_out=64
    batch, seq, d_in, d_out = 2, 8, 32, 64

    key = jax.random.PRNGKey(0)
    kx, kw1, kw2, kg, kb = jax.random.split(key, 5)

    x = jax.random.normal(kx, (batch, seq, d_in), dtype=jnp.float32)

    # Deterministic synthetic parameters (no checkpoint load).
    # nn.Linear weight has shape (d_out, d_in); we store the transpose directly.
    w1_t = (jax.random.normal(kw1, (d_in, d_out), dtype=jnp.float32)
            * (1.0 / math.sqrt(d_in)))
    w2_t = (jax.random.normal(kw2, (d_out, d_out), dtype=jnp.float32)
            * (1.0 / math.sqrt(d_out)))
    gamma = 1.0 + 0.1 * jax.random.normal(kg, (d_out,), dtype=jnp.float32)
    beta = 0.1 * jax.random.normal(kb, (d_out,), dtype=jnp.float32)

    # f32 path (exact vs. reference).
    out = projection_forward(x, w1_t, w2_t, gamma, beta, block_rows=256)
    out = jax.block_until_ready(out)
    ref = _reference(x, w1_t, w2_t, gamma, beta)
    assert out.shape == (batch, seq, d_out), out.shape
    assert jnp.allclose(out, ref, atol=1e-4, rtol=1e-4), (
        float(jnp.max(jnp.abs(out - ref))))

    # bf16 path (native MXU dtype, f32 accumulation) — looser tolerance.
    x_bf = x.astype(jnp.bfloat16)
    w1_bf = w1_t.astype(jnp.bfloat16)
    w2_bf = w2_t.astype(jnp.bfloat16)
    out_bf = projection_forward(x_bf, w1_bf, w2_bf, gamma, beta, block_rows=256)
    out_bf = jax.block_until_ready(out_bf)
    ref_bf = _reference(x_bf, w1_bf, w2_bf, gamma, beta)
    assert out_bf.shape == (batch, seq, d_out), out_bf.shape
    assert jnp.allclose(out_bf.astype(jnp.float32), ref_bf, atol=1.5e-1, rtol=5e-2), (
        float(jnp.max(jnp.abs(out_bf.astype(jnp.float32) - ref_bf))))

    print("KERNEL_OK")
</pallas_src>

<mosaic_0001>
module attributes {stable_mosaic.version = 11 : i64} {
  func.func @_projection_kernel(%arg0: i32, %arg1: memref<16x32xf32, #tpu.memory_space<vmem>>, %arg2: memref<32x128xf32, #tpu.memory_space<vmem>>, %arg3: memref<128x128xf32, #tpu.memory_space<vmem>>, %arg4: memref<1x128xf32, #tpu.memory_space<vmem>>, %arg5: memref<1x128xf32, #tpu.memory_space<vmem>>, %arg6: memref<16x128xf32, #tpu.memory_space<vmem>>) attributes {dimension_semantics = [#tpu.dimension_semantics<parallel>], iteration_bounds = array<i64: 1>, scalar_prefetch = 0 : i64, scratch_operands = 0 : i64, tpu.core_type = #tpu.core_type<tc>, window_params = [{transform_indices = @transform_0, window_bounds = array<i64: 16, 32>}, {pipeline_mode = #tpu.pipeline_mode<synchronous>, transform_indices = @transform_1, window_bounds = array<i64: 32, 128>}, {pipeline_mode = #tpu.pipeline_mode<synchronous>, transform_indices = @transform_2, window_bounds = array<i64: 128, 128>}, {pipeline_mode = #tpu.pipeline_mode<synchronous>, transform_indices = @transform_3, window_bounds = array<i64: 1, 128>}, {pipeline_mode = #tpu.pipeline_mode<synchronous>, transform_indices = @transform_4, window_bounds = array<i64: 1, 128>}, {transform_indices = @transform_5, window_bounds = array<i64: 16, 128>}]} {
    %c0 = arith.constant 0 : index
    %c0_0 = arith.constant 0 : index
    %0 = vector.load %arg1[%c0, %c0_0] : memref<16x32xf32, #tpu.memory_space<vmem>>, vector<16x32xf32>
    %c0_1 = arith.constant 0 : index
    %c0_2 = arith.constant 0 : index
    %1 = vector.load %arg2[%c0_1, %c0_2] : memref<32x128xf32, #tpu.memory_space<vmem>>, vector<32x128xf32>
    %cst = arith.constant dense<0.000000e+00> : vector<16x128xf32>
    %2 = tpu.matmul %0, %1, %cst {dimension_numbers = #tpu.dot_dimension_numbers<[1], [0], [0], [1], [0, 0, 1, 1], [], []>} : vector<16x32xf32>, vector<32x128xf32>, vector<16x128xf32> -> vector<16x128xf32>
    %cst_3 = arith.constant 5.000000e-01 : f32
    %3 = vector.broadcast %cst_3 : f32 to vector<16x128xf32>
    %4 = arith.mulf %3, %2 : vector<16x128xf32>
    %cst_4 = arith.constant 0.707106769 : f32
    %5 = vector.broadcast %cst_4 : f32 to vector<16x128xf32>
    %6 = arith.mulf %2, %5 : vector<16x128xf32>
    %7 = math.erf %6 : vector<16x128xf32>
    %cst_5 = arith.constant 1.000000e+00 : f32
    %8 = vector.broadcast %cst_5 : f32 to vector<16x128xf32>
    %9 = arith.addf %8, %7 : vector<16x128xf32>
    %10 = arith.mulf %4, %9 : vector<16x128xf32>
    %c0_6 = arith.constant 0 : index
    %c0_7 = arith.constant 0 : index
    %11 = vector.load %arg3[%c0_6, %c0_7] : memref<128x128xf32, #tpu.memory_space<vmem>>, vector<128x128xf32>
    %cst_8 = arith.constant dense<0.000000e+00> : vector<16x128xf32>
    %12 = tpu.matmul %10, %11, %cst_8 {dimension_numbers = #tpu.dot_dimension_numbers<[1], [0], [0], [1], [0, 0, 1, 1], [], []>} : vector<16x128xf32>, vector<128x128xf32>, vector<16x128xf32> -> vector<16x128xf32>
    %13 = arith.addf %2, %12 : vector<16x128xf32>
    %cst_9 = arith.constant dense<0.000000e+00> : vector<16xf32>
    %14 = vector.multi_reduction <add>, %13, %cst_9 [1] : vector<16x128xf32> to vector<16xf32>
    %15 = vector.shape_cast %14 : vector<16xf32> to vector<16x1xf32>
    %cst_10 = arith.constant 1.562500e-02 : f32
    %16 = vector.broadcast %cst_10 : f32 to vector<16x1xf32>
    %17 = arith.mulf %15, %16 : vector<16x1xf32>
    %18 = vector.broadcast %17 : vector<16x1xf32> to vector<16x128xf32>
    %19 = arith.subf %13, %18 : vector<16x128xf32>
    %20 = tpu.iota {dimensions = array<i32: 1>} : vector<1x128xi32>
    %c64_i32 = arith.constant 64 : i32
    %21 = vector.broadcast %c64_i32 : i32 to vector<1x128xi32>
    %22 = arith.cmpi slt, %20, %21 : vector<1x128xi32>
    %cst_11 = arith.constant 0.000000e+00 : f32
    %23 = vector.shape_cast %22 : vector<1x128xi1> to vector<1x128xi1>
    %24 = vector.broadcast %23 : vector<1x128xi1> to vector<16x128xi1>
    %25 = vector.broadcast %cst_11 : f32 to vector<16x128xf32>
    %26 = arith.select %24, %19, %25 : vector<16x128xi1>, vector<16x128xf32>
    %27 = arith.mulf %26, %26 : vector<16x128xf32>
    %cst_12 = arith.constant dense<0.000000e+00> : vector<16xf32>
    %28 = vector.multi_reduction <add>, %27, %cst_12 [1] : vector<16x128xf32> to vector<16xf32>
    %29 = vector.shape_cast %28 : vector<16xf32> to vector<16x1xf32>
    %cst_13 = arith.constant 1.562500e-02 : f32
    %30 = vector.broadcast %cst_13 : f32 to vector<16x1xf32>
    %31 = arith.mulf %29, %30 : vector<16x1xf32>
    %cst_14 = arith.constant 9.99999974E-6 : f32
    %32 = vector.broadcast %cst_14 : f32 to vector<16x1xf32>
    %33 = arith.addf %31, %32 : vector<16x1xf32>
    %34 = math.rsqrt %33 : vector<16x1xf32>
    %35 = vector.broadcast %34 : vector<16x1xf32> to vector<16x128xf32>
    %36 = arith.mulf %26, %35 : vector<16x128xf32>
    %c0_15 = arith.constant 0 : index
    %c0_16 = arith.constant 0 : index
    %37 = vector.load %arg4[%c0_15, %c0_16] : memref<1x128xf32, #tpu.memory_space<vmem>>, vector<1x128xf32>
    %38 = vector.broadcast %37 : vector<1x128xf32> to vector<16x128xf32>
    %39 = arith.mulf %36, %38 : vector<16x128xf32>
    %c0_17 = arith.constant 0 : index
    %c0_18 = arith.constant 0 : index
    %40 = vector.load %arg5[%c0_17, %c0_18] : memref<1x128xf32, #tpu.memory_space<vmem>>, vector<1x128xf32>
    %41 = vector.broadcast %40 : vector<1x128xf32> to vector<16x128xf32>
    %42 = arith.addf %39, %41 : vector<16x128xf32>
    %c0_19 = arith.constant 0 : index
    %c0_20 = arith.constant 0 : index
    %43 = vector.load %arg6[%c0_19, %c0_20] : memref<16x128xf32, #tpu.memory_space<vmem>>, vector<16x128xf32>
    tpu.vector_store %arg6[%c0_19, %c0_20], %42 {strides = array<i32>} : memref<16x128xf32, #tpu.memory_space<vmem>>, vector<16x128xf32>,
    return
  }
  func.func @transform_0(%arg0: i32) -> (i32, i32) {
    %c0_i32 = arith.constant 0 : i32
    %c0_i32_0 = arith.constant 0 : i32
    return %arg0, %c0_i32 : i32, i32
  }
  func.func @transform_1(%arg0: i32) -> (i32, i32) {
    %c0_i32 = arith.constant 0 : i32
    %c0_i32_0 = arith.constant 0 : i32
    %c0_i32_1 = arith.constant 0 : i32
    return %c0_i32, %c0_i32_0 : i32, i32
  }
  func.func @transform_2(%arg0: i32) -> (i32, i32) {
    %c0_i32 = arith.constant 0 : i32
    %c0_i32_0 = arith.constant 0 : i32
    %c0_i32_1 = arith.constant 0 : i32
    return %c0_i32, %c0_i32_0 : i32, i32
  }
  func.func @transform_3(%arg0: i32) -> (i32, i32) {
    %c0_i32 = arith.constant 0 : i32
    %c0_i32_0 = arith.constant 0 : i32
    %c0_i32_1 = arith.constant 0 : i32
    return %c0_i32, %c0_i32_0 : i32, i32
  }
  func.func @transform_4(%arg0: i32) -> (i32, i32) {
    %c0_i32 = arith.constant 0 : i32
    %c0_i32_0 = arith.constant 0 : i32
    %c0_i32_1 = arith.constant 0 : i32
    return %c0_i32, %c0_i32_0 : i32, i32
  }
  func.func @transform_5(%arg0: i32) -> (i32, i32) {
    %c0_i32 = arith.constant 0 : i32
    %c0_i32_0 = arith.constant 0 : i32
    return %arg0, %c0_i32 : i32, i32
  }
}

module attributes {stable_mosaic.version = 11 : i64} {
  func.func @_projection_kernel(%arg0: i32, %arg1: memref<16x32xf32, #tpu.memory_space<vmem>>, %arg2: memref<32x128xf32, #tpu.memory_space<vmem>>, %arg3: memref<128x128xf32, #tpu.memory_space<vmem>>, %arg4: memref<1x128xf32, #tpu.memory_space<vmem>>, %arg5: memref<1x128xf32, #tpu.memory_space<vmem>>, %arg6: memref<16x128xf32, #tpu.memory_space<vmem>>) attributes {dimension_semantics = [#tpu.dimension_semantics<parallel>], iteration_bounds = array<i64: 1>, scalar_prefetch = 0 : i64, scratch_operands = 0 : i64, tpu.core_type = #tpu.core_type<tc>, window_params = [{transform_indices = @transform_0, window_bounds = array<i64: 16, 32>}, {pipeline_mode = #tpu.pipeline_mode<synchronous>, transform_indices = @transform_1, window_bounds = array<i64: 32, 128>}, {pipeline_mode = #tpu.pipeline_mode<synchronous>, transform_indices = @transform_2, window_bounds = array<i64: 128, 128>}, {pipeline_mode = #tpu.pipeline_mode<synchronous>, transform_indices = @transform_3, window_bounds = array<i64: 1, 128>}, {pipeline_mode = #tpu.pipeline_mode<synchronous>, transform_indices = @transform_4, window_bounds = array<i64: 1, 128>}, {transform_indices = @transform_5, window_bounds = array<i64: 16, 128>}]} {
    %c0 = arith.constant 0 : index
    %c0_0 = arith.constant 0 : index
    %0 = vector.load %arg1[%c0, %c0_0] : memref<16x32xf32, #tpu.memory_space<vmem>>, vector<16x32xf32>
    %c0_1 = arith.constant 0 : index
    %c0_2 = arith.constant 0 : index
    %1 = vector.load %arg2[%c0_1, %c0_2] : memref<32x128xf32, #tpu.memory_space<vmem>>, vector<32x128xf32>
    %cst = arith.constant dense<0.000000e+00> : vector<16x128xf32>
    %2 = tpu.matmul %0, %1, %cst {dimension_numbers = #tpu.dot_dimension_numbers<[1], [0], [0], [1], [0, 0, 1, 1], [], []>} : vector<16x32xf32>, vector<32x128xf32>, vector<16x128xf32> -> vector<16x128xf32>
    %cst_3 = arith.constant 5.000000e-01 : f32
    %3 = vector.broadcast %cst_3 : f32 to vector<16x128xf32>
    %4 = arith.mulf %3, %2 : vector<16x128xf32>
    %cst_4 = arith.constant 0.707106769 : f32
    %5 = vector.broadcast %cst_4 : f32 to vector<16x128xf32>
    %6 = arith.mulf %2, %5 : vector<16x128xf32>
    %7 = math.erf %6 : vector<16x128xf32>
    %cst_5 = arith.constant 1.000000e+00 : f32
    %8 = vector.broadcast %cst_5 : f32 to vector<16x128xf32>
    %9 = arith.addf %8, %7 : vector<16x128xf32>
    %10 = arith.mulf %4, %9 : vector<16x128xf32>
    %c0_6 = arith.constant 0 : index
    %c0_7 = arith.constant 0 : index
    %11 = vector.load %arg3[%c0_6, %c0_7] : memref<128x128xf32, #tpu.memory_space<vmem>>, vector<128x128xf32>
    %cst_8 = arith.constant dense<0.000000e+00> : vector<16x128xf32>
    %12 = tpu.matmul %10, %11, %cst_8 {dimension_numbers = #tpu.dot_dimension_numbers<[1], [0], [0], [1], [0, 0, 1, 1], [], []>} : vector<16x128xf32>, vector<128x128xf32>, vector<16x128xf32> -> vector<16x128xf32>
    %13 = arith.addf %2, %12 : vector<16x128xf32>
    %cst_9 = arith.constant dense<0.000000e+00> : vector<16xf32>
    %14 = vector.multi_reduction <add>, %13, %cst_9 [1] : vector<16x128xf32> to vector<16xf32>
    %15 = vector.shape_cast %14 : vector<16xf32> to vector<16x1xf32>
    %cst_10 = arith.constant 1.562500e-02 : f32
    %16 = vector.broadcast %cst_10 : f32 to vector<16x1xf32>
    %17 = arith.mulf %15, %16 : vector<16x1xf32>
    %18 = vector.broadcast %17 : vector<16x1xf32> to vector<16x128xf32>
    %19 = arith.subf %13, %18 : vector<16x128xf32>
    %20 = tpu.iota {dimensions = array<i32: 1>} : vector<1x128xi32>
    %c64_i32 = arith.constant 64 : i32
    %21 = vector.broadcast %c64_i32 : i32 to vector<1x128xi32>
    %22 = arith.cmpi slt, %20, %21 : vector<1x128xi32>
    %cst_11 = arith.constant 0.000000e+00 : f32
    %23 = vector.shape_cast %22 : vector<1x128xi1> to vector<1x128xi1>
    %24 = vector.broadcast %23 : vector<1x128xi1> to vector<16x128xi1>
    %25 = vector.broadcast %cst_11 : f32 to vector<16x128xf32>
    %26 = arith.select %24, %19, %25 : vector<16x128xi1>, vector<16x128xf32>
    %27 = arith.mulf %26, %26 : vector<16x128xf32>
    %cst_12 = arith.constant dense<0.000000e+00> : vector<16xf32>
    %28 = vector.multi_reduction <add>, %27, %cst_12 [1] : vector<16x128xf32> to vector<16xf32>
    %29 = vector.shape_cast %28 : vector<16xf32> to vector<16x1xf32>
    %cst_13 = arith.constant 1.562500e-02 : f32
    %30 = vector.broadcast %cst_13 : f32 to vector<16x1xf32>
    %31 = arith.mulf %29, %30 : vector<16x1xf32>
    %cst_14 = arith.constant 9.99999974E-6 : f32
    %32 = vector.broadcast %cst_14 : f32 to vector<16x1xf32>
    %33 = arith.addf %31, %32 : vector<16x1xf32>
    %34 = math.rsqrt %33 : vector<16x1xf32>
    %35 = vector.broadcast %34 : vector<16x1xf32> to vector<16x128xf32>
    %36 = arith.mulf %26, %35 : vector<16x128xf32>
    %c0_15 = arith.constant 0 : index
    %c0_16 = arith.constant 0 : index
    %37 = vector.load %arg4[%c0_15, %c0_16] : memref<1x128xf32, #tpu.memory_space<vmem>>, vector<1x128xf32>
    %38 = vector.broadcast %37 : vector<1x128xf32> to vector<16x128xf32>
    %39 = arith.mulf %36, %38 : vector<16x128xf32>
    %c0_17 = arith.constant 0 : index
    %c0_18 = arith.constant 0 : index
    %40 = vector.load %arg5[%c0_17, %c0_18] : memref<1x128xf32, #tpu.memory_space<vmem>>, vector<1x128xf32>
    %41 = vector.broadcast %40 : vector<1x128xf32> to vector<16x128xf32>
    %42 = arith.addf %39, %41 : vector<16x128xf32>
    %c0_19 = arith.constant 0 : index
    %c0_20 = arith.constant 0 : index
    %43 = vector.load %arg6[%c0_19, %c0_20] : memref<16x128xf32, #tpu.memory_space<vmem>>, vector<16x128xf32>
    tpu.vector_store %arg6[%c0_19, %c0_20], %42 {strides = array<i32>} : memref<16x128xf32, #tpu.memory_space<vmem>>, vector<16x128xf32>,
    return
  }
  func.func @transform_0(%arg0: i32) -> (i32, i32) {
    %c0_i32 = arith.constant 0 : i32
    %c0_i32_0 = arith.constant 0 : i32
    return %arg0, %c0_i32 : i32, i32
  }
  func.func @transform_1(%arg0: i32) -> (i32, i32) {
    %c0_i32 = arith.constant 0 : i32
    %c0_i32_0 = arith.constant 0 : i32
    %c0_i32_1 = arith.constant 0 : i32
    return %c0_i32, %c0_i32_0 : i32, i32
  }
  func.func @transform_2(%arg0: i32) -> (i32, i32) {
    %c0_i32 = arith.constant 0 : i32
    %c0_i32_0 = arith.constant 0 : i32
    %c0_i32_1 = arith.constant 0 : i32
    return %c0_i32, %c0_i32_0 : i32, i32
  }
  func.func @transform_3(%arg0: i32) -> (i32, i32) {
    %c0_i32 = arith.constant 0 : i32
    %c0_i32_0 = arith.constant 0 : i32
    %c0_i32_1 = arith.constant 0 : i32
    return %c0_i32, %c0_i32_0 : i32, i32
  }
  func.func @transform_4(%arg0: i32) -> (i32, i32) {
    %c0_i32 = arith.constant 0 : i32
    %c0_i32_0 = arith.constant 0 : i32
    %c0_i32_1 = arith.constant 0 : i32
    return %c0_i32, %c0_i32_0 : i32, i32
  }
  func.func @transform_5(%arg0: i32) -> (i32, i32) {
    %c0_i32 = arith.constant 0 : i32
    %c0_i32_0 = arith.constant 0 : i32
    return %arg0, %c0_i32 : i32, i32
  }
}

</mosaic_0001>

<bundles_post_ra>
// kernel: tpu_custom_call.1
= control target key start
LH: loop header
LB: loop body
LE: loop exit
PB: predicated region body
PF: predicated region fallthrough
CT: control target
= control target key end

     0   :  { %10 = vsyncpa [#allocation3], 0  ;;  %s653_s0 = inlined_call_operand.hbm [shape: f32[16,32], index: 0, kind: input, shape index: {}]   ;;  %s654_s1 = inlined_call_operand.hbm [shape: f32[32,128], index: 1, kind: input, shape index: {}]   ;;  %s655_s2 = inlined_call_operand.hbm [shape: f32[128,128], index: 2, kind: input, shape index: {}]   ;;  %s656_s3 = inlined_call_operand.vmem [shape: f32[1,128], index: 3, kind: input, shape index: {}]   ;;  %s657_s4 = inlined_call_operand.vmem [shape: f32[1,128], index: 4, kind: input, shape index: {}]   ;;  %s658_s5 = inlined_call_operand.hbm [shape: f32[16,128], index: 5, kind: output, shape index: {}]  }
   0x1   :  { %11 = vsyncpa [#allocation6], 0 }
   0x2   :  { %12 = vsyncpa [#allocation4], 0  ;;  %s542_s18 = smov [#allocation5]   ;;  %s543_s20 = smov [#allocation2]  }
   0x3   :  { %s30_s19 = sshll.u32 %s542_s18, 4  ;;  %s18_s21 = sshll.u32 %s543_s20, 4  ;;  %s31_s19 = int_to_ptr.vmem [resolvable:$true] %s30_s19  ;;  %s578_s21 = int_to_ptr.vmem [resolvable:$true] %s18_s21 }
   0x4   :  { %s448_s24 = scalar_lea.hbm %s654_s1, 512 }
   0x5   :  { %p449_p0 = scmp.ne.s32.totalorder %s654_s1, %s448_s24  ;;  %p452_p1 = scmp.lt.u32.totalorder %s448_s24, %s654_s1 }
   0x7   :  { %p454_p2 = pnand %p452_p1, %p449_p0 }
   0x9   :  { %457 = shalt.err (!%p454_p2)
}
   0xa   :  { %s458_s29 = scalar_lea.vmem %s31_s19, 512  ;;  %p463_p4 = scmp.lt.s32.totalorder %s31_s19, %s31_s19 }
   0xb   :  { %p459_p3 = scmp.ne.s32.totalorder %s31_s19, %s458_s29  ;;  %p464_p5 = scmp.lt.s32.totalorder %s458_s29, %s458_s29 }
   0xd   :  { %p465_p6 = por %p464_p5, %p463_p4 }
   0xf   :  { %p466_p7 = pnand %p465_p6, %p459_p3 }
  0x11   :  { %469 = shalt.err (!%p466_p7)
}
  0x12   :  { %s544_s30 = smov 128   ;;  %s545_s6 = smov 8  }
  0x13   :  { %36 = dma.hbm_to_vmem [thread:$0]  %s654_s1, 512, %s31_s19, [#allocation6], %s544_s30, %s544_s30, %s545_s6  }
  0x14   :  { %s470_s11 = scalar_lea.hbm %s653_s0, 256 }
  0x15   :  { %p471_p8 = scmp.ne.s32.totalorder %s653_s0, %s470_s11  ;;  %p474_p9 = scmp.lt.u32.totalorder %s470_s11, %s653_s0 }
  0x17   :  { %p476_p10 = pnand %p474_p9, %p471_p8 }
  0x19   :  { %479 = shalt.err (!%p476_p10)
}
  0x1a   :  { %s480_s16 = scalar_lea.vmem %s578_s21, 256  ;;  %p485_p12 = scmp.lt.s32.totalorder %s578_s21, %s578_s21 }
  0x1b   :  { %p481_p11 = scmp.ne.s32.totalorder %s578_s21, %s480_s16  ;;  %p486_p13 = scmp.lt.s32.totalorder %s480_s16, %s480_s16 }
  0x1d   :  { %p487_p0 = por %p486_p13, %p485_p12 }
  0x1f   :  { %p488_p1 = pnand %p487_p0, %p481_p11 }
  0x21   :  { %491 = shalt.err (!%p488_p1)
}
  0x22   :  { %24 = dma.hbm_to_vmem [thread:$0]  %s653_s0, 256, %s578_s21, [#allocation3], %s544_s30, %s544_s30, %s545_s6  }
  0x23   :  { %s546_s18 = smov [#allocation7]   ;;  %s492_s23 = scalar_lea.hbm %s655_s2, 2048 }
  0x24   :  { %s42_s19 = sshll.u32 %s546_s18, 4  ;;  %p493_p2 = scmp.ne.s32.totalorder %s655_s2, %s492_s23  ;;  %s43_s19 = int_to_ptr.vmem [resolvable:$true] %s42_s19 }
  0x25   :  { %p496_p3 = scmp.lt.u32.totalorder %s492_s23, %s655_s2 }
  0x27   :  { %p498_p4 = pnand %p496_p3, %p493_p2 }
  0x29   :  { %501 = shalt.err (!%p498_p4)
}
  0x2a   :  { %s502_s28 = scalar_lea.vmem %s43_s19, 2048  ;;  %p507_p6 = scmp.lt.s32.totalorder %s43_s19, %s43_s19 }
  0x2b   :  { %p503_p5 = scmp.ne.s32.totalorder %s43_s19, %s502_s28  ;;  %p508_p7 = scmp.lt.s32.totalorder %s502_s28, %s502_s28 }
  0x2d   :  { %p509_p8 = por %p508_p7, %p507_p6 }
  0x2f   :  { %p510_p9 = pnand %p509_p8, %p503_p5 }
  0x31   :  { %513 = shalt.err (!%p510_p9)
}
  0x32   :  { %48 = dma.hbm_to_vmem [thread:$0]  %s655_s2, 2048, %s43_s19, [#allocation6], %s544_s30, %s544_s30, %s545_s6  }
  0x33   :  { %536 = dma.done.wait [#allocation3], 256  }
  0x34   :  { %537 = vsyncadd [#allocation3], 4294967040 }
  0x35   :  { %538 = dma.done.wait [#allocation6], 2560  }
  0x36   :  { %539 = vsyncadd [#allocation6], 4294964736  ;;  %vm68_vm0 = vcmask 261120   ;;  %v64_v0 = vld [vmem:[#allocation5] sm:$0xff]  ;;  %v65_v1 = vld [vmem:[#allocation5 + $0x8] sm:$0xff]  ;;  %v261_v48 = vlaneseq  ;;  %s547_s9 = smov [#allocation8]  }
  0x37   :  { %v66_v2 = vld [vmem:[#allocation5 + $0x10] sm:$0xff]  ;;  %v394_v3 = vpack.c.bf16 %v65_v1, %v64_v0  ;;  %v67_v4 = vld [vmem:[#allocation5 + $0x18] sm:$0xff]  ;;  %v160_v7 = vld [vmem:[#allocation7] sm:$0xff]  ;;  %s307_s10 = sshll.u32 %s547_s9, 4  ;;  %s308_s10 = int_to_ptr.vmem [resolvable:$true] %s307_s10 }
  0x38   :  { %v62_v5 = vld [vmem:[#allocation2] sm:$0xff]  ;;  %v398_v6 = vpack.c.bf16 %v67_v4, %v66_v2  ;;  %v161_v8 = vld [vmem:[#allocation7 + $0x8] sm:$0xff]  ;;  %v163_v11 = vld [vmem:[#allocation7 + $0x18] sm:$0xff]  ;;  %v262_v49 = vand.u32 127, %v261_v48  ;;  %s514_s11 = scalar_lea.vmem %s308_s10, 256  ;;  %p519_p11 = scmp.lt.s32.totalorder %s308_s10, %s308_s10 }
  0x39   :  { %356 = vmatprep.mubr.msk.f32.mxu0 %vm68_vm0, %v62_v5  ;;  %v162_v9 = vld [vmem:[#allocation7 + $0x10] sm:$0xff]  ;;  %395 = vmatprep.subr.bf16.mxu0 %v394_v3  ;;  %v402_v10 = vpack.c.bf16 %v161_v8, %v160_v7  ;;  %v164_v13 = vld [vmem:[#allocation7 + $0x20] sm:$0xff]  ;;  %v165_v14 = vld [vmem:[#allocation7 + $0x28] sm:$0xff]  ;;  %p515_p10 = scmp.ne.s32.totalorder %s308_s10, %s514_s11  ;;  %p520_p12 = scmp.lt.s32.totalorder %s514_s11, %s514_s11 }
  0x3a   :  { %397 = vmatpush3.bf16.msra.mxu0 %v394_v3  ;;  %v406_v12 = vpack.c.bf16 %v163_v11, %v162_v9  ;;  %v410_v15 = vpack.c.bf16 %v165_v14, %v164_v13  ;;  %v63_v16 = vld [vmem:[#allocation2 + $0x8] sm:$0xff]  ;;  %v166_v17 = vld [vmem:[#allocation7 + $0x30] sm:$0xff]  ;;  %v168_v20 = vld [vmem:[#allocation7 + $0x40] sm:$0xff]  ;;  %vm263_vm1 = vcmp.lt.s32.totalorder %v262_v49, 64 }
  0x3b   :  { %399 = vmatprep.subr.bf16.mxu0 %v398_v6  ;;  %403 = vmatprep.subr.bf16.mxu1 %v402_v10  ;;  %v167_v18 = vld [vmem:[#allocation7 + $0x38] sm:$0xff]  ;;  %v169_v21 = vld [vmem:[#allocation7 + $0x48] sm:$0xff]  ;;  %v170_v23 = vld [vmem:[#allocation7 + $0x50] sm:$0xff]  ;;  %p521_p13 = por %p520_p12, %p519_p11 }
  0x3c   :  { %405 = vmatpush3.bf16.msra.mxu1 %v402_v10  ;;  %v414_v19 = vpack.c.bf16 %v167_v18, %v166_v17  ;;  %v418_v22 = vpack.c.bf16 %v169_v21, %v168_v20  ;;  %v171_v24 = vld [vmem:[#allocation7 + $0x58] sm:$0xff]  ;;  %v172_v25 = vld [vmem:[#allocation7 + $0x60] sm:$0xff]  ;;  %v173_v27 = vld [vmem:[#allocation7 + $0x68] sm:$0xff] }
  0x3d   :  { %407 = vmatprep.subr.bf16.mxu1 %v406_v12  ;;  %v422_v26 = vpack.c.bf16 %v171_v24, %v170_v23  ;;  %v426_v28 = vpack.c.bf16 %v173_v27, %v172_v25  ;;  %v174_v29 = vld [vmem:[#allocation7 + $0x70] sm:$0xff]  ;;  %v175_v30 = vld [vmem:[#allocation7 + $0x78] sm:$0xff]  ;;  %p522_p0 = pnand %p521_p13, %p515_p10 }
  0x3e   :  { %401 = vmatpush3.bf16.msra.mxu0 %v398_v6  ;;  %v430_v31 = vpack.c.bf16 %v175_v30, %v174_v29  ;;  %v322_v3 = vld [vmem:[%s656_s3] ss:$0 sm:$0xff] }
  0x3f   :  { %v323_v5 = vld [vmem:[%s657_s4] ss:$0 sm:$0xff] }
  0x40   :  { %409 = vmatpush3.bf16.msra.mxu1 %v406_v12 }
  0x41   :  { %357 = vmatmul.mubr.msk.f32.vlgmr.msra.gmra.mrb[0].mxu0 %vm68_vm0, %v63_v16  ;;  %411 = vmatprep.subr.bf16.mxu1 %v410_v15 }
  0x44   :  { %413 = vmatpush3.bf16.msra.mxu1 %v410_v15 }
  0x45   :  { %415 = vmatprep.subr.bf16.mxu1 %v414_v19 }
  0x48   :  { %417 = vmatpush3.bf16.msra.mxu1 %v414_v19 }
  0x49   :  { %419 = vmatprep.subr.bf16.mxu1 %v418_v22 }
  0x4c   :  { %421 = vmatpush3.bf16.msra.mxu1 %v418_v22 }
  0x4d   :  { %423 = vmatprep.subr.bf16.mxu1 %v422_v26 }
  0x50   :  { %425 = vmatpush3.bf16.msra.mxu1 %v422_v26 }
  0x51   :  { %427 = vmatprep.subr.bf16.mxu1 %v426_v28 }
  0x54   :  { %429 = vmatpush3.bf16.msra.mxu1 %v426_v28 }
  0x55   :  { %431 = vmatprep.subr.bf16.mxu1 %v430_v31 }
  0x58   :  { %433 = vmatpush3.bf16.msra.mxu1 %v430_v31 }
 0x114   :  { %v358_v32 = vpop.f32.mrb[0].mxu0 }
 0x115   :  { %v153_v33 = vmul.f32 0.70710677, %v358_v32  ;;  %v141_v34 = vpop.f32.mrb[1].mxu0  ;;  %v151_v41 = vmul.f32 0.5, %v358_v32 }
 0x116   :  { %v152_v35 = vmul.f32 0.70710677, %v141_v34  ;;  %v150_v39 = vmul.f32 0.5, %v141_v34 }
 0x117   :  { %440 = verf.f32 %v153_v33 }
 0x118   :  { %442 = verf.f32 %v152_v35 }
 0x121   :  { %v441_v36 = vpop.eup %440 }
 0x122   :  { %v443_v37 = vpop.eup %442  ;;  %v157_v38 = vadd.f32 1.0, %v441_v36 }
 0x123   :  { %v156_v40 = vadd.f32 1.0, %v443_v37 }
 0x124   :  { %v159_v43 = vmul.f32 %v157_v38, %v151_v41 }
 0x125   :  { %v158_v42 = vmul.f32 %v156_v40, %v150_v39 }
 0x127   :  { %391 = vmatprep.mubr.f32.mxu1 %v158_v42 }
 0x128   :  { %392 = vmatmul.mubr.f32.vlgmr.msra.gmra.mrb[0].mxu1 %v159_v43 }
 0x1fb   :  { %v393_v44 = vpop.f32.mrb[0].mxu1 }
 0x1fc   :  { %v252_v45 = vadd.f32 %v393_v44, %v358_v32  ;;  %v242_v46 = vpop.f32.mrb[1].mxu1 }
 0x1fd   :  { %v251_v47 = vadd.f32 %v242_v46, %v141_v34 }
 0x1ff   :  { %253 = vadd.xlane.f32.xlu0 %v251_v47 }
 0x203   :  { %255 = vadd.xlane.f32.xlu0 %v252_v45 }
 0x28c   :  { %v254_v50 = vpop.xlane.xlu0 %253 }
 0x28d   :  { %v257_v51 = vmul.f32 0.015625, %v254_v50 }
 0x28f   :  { %v259_v52 = vsub.f32 %v251_v47, %v257_v51 }
 0x290   :  { %v256_v53 = vpop.xlane.xlu0 %255 }
 0x291   :  { %v258_v54 = vmul.f32 0.015625, %v256_v53  ;;  %v266_v55 = vsel %vm263_vm1, %v259_v52, 0.0 }
 0x292   :  { %v268_v56 = vmul.f32 %v266_v55, %v266_v55 }
 0x293   :  { %v260_v57 = vsub.f32 %v252_v45, %v258_v54 }
 0x294   :  { %270 = vadd.xlane.f32.xlu1 %v268_v56 }
 0x295   :  { %v267_v58 = vsel %vm263_vm1, %v260_v57, 0.0 }
 0x296   :  { %v269_v59 = vmul.f32 %v267_v58, %v267_v58 }
 0x298   :  { %272 = vadd.xlane.f32.xlu1 %v269_v59 }
 0x321   :  { %v271_v60 = vpop.xlane.xlu1 %270 }
 0x322   :  { %v274_v61 = vmul.f32 0.015625, %v271_v60 }
 0x324   :  { %v276_v62 = vadd.f32 1e-05, %v274_v61 }
 0x325   :  { %v273_v63 = vpop.xlane.xlu1 %272 }
 0x326   :  { %444 = vrsqrt.f32 %v276_v62  ;;  %v275_v0 = vmul.f32 0.015625, %v273_v63 }
 0x328   :  { %v277_v1 = vadd.f32 1e-05, %v275_v0 }
 0x32a   :  { %446 = vrsqrt.f32 %v277_v1 }
 0x330   :  { %v445_v2 = vpop.eup %444 }
 0x331   :  { %v280_v4 = vmul.f32 %v445_v2, %v266_v55 }
 0x333   :  { %v289_v6 = vmul.f32 %v322_v3, %v280_v4 }
 0x334   :  { %v447_v7 = vpop.eup %446 }
 0x335   :  { %v281_v8 = vmul.f32 %v447_v7, %v267_v58  ;;  %v298_v9 = vadd.f32 %v323_v5, %v289_v6 }
 0x337   :  { %v290_v10 = vmul.f32 %v322_v3, %v281_v8  ;;  %300 = vst [vmem:[#allocation8] sm:$0xff] %v298_v9 }
 0x339   :  { %v299_v11 = vadd.f32 %v323_v5, %v290_v10 }
 0x33b   :  { %301 = vst [vmem:[#allocation8 + $0x8] sm:$0xff] %v299_v11 }
 0x33c   :  { %525 = shalt.err (!%p522_p0)
}
 0x33d   :  { %s526_s12 = scalar_lea.hbm %s658_s5, 256 }
 0x33e   :  { %p527_p1 = scmp.ne.s32.totalorder %s658_s5, %s526_s12  ;;  %p530_p2 = scmp.lt.u32.totalorder %s526_s12, %s658_s5 }
 0x340   :  { %p532_p3 = pnand %p530_p2, %p527_p1 }
 0x342   :  { %535 = shalt.err (!%p532_p3)
}
 0x343   :  { %313 = dma.vmem_to_hbm [thread:$0]  %s308_s10, 256, %s658_s5, [#allocation4], %s544_s30, %s544_s30, %s545_s6  }
 0x344   :  { %540 = dma.done.wait [#allocation4], 256  }
 0x345   :  { %541 = vsyncadd [#allocation4], 4294967040 }
 0x346   :  { %317 = vsyncpa [#allocation3], 1 }
 0x347   :  { %318 = vsyncpa [#allocation6], 1 }
 0x348   :  { %319 = vsyncpa [#allocation4], 1 }

// kernel: tpu_custom_call.1
= control target key start
LH: loop header
LB: loop body
LE: loop exit
PB: predicated region body
PF: predicated region fallthrough
CT: control target
= control target key end

     0   :  { %10 = vsyncpa [#allocation3], 0  ;;  %s653_s0 = inlined_call_operand.hbm [shape: f32[16,32], index: 0, kind: input, shape index: {}]   ;;  %s654_s1 = inlined_call_operand.hbm [shape: f32[32,128], index: 1, kind: input, shape index: {}]   ;;  %s655_s2 = inlined_call_operand.hbm [shape: f32[128,128], index: 2, kind: input, shape index: {}]   ;;  %s656_s3 = inlined_call_operand.vmem [shape: f32[1,128], index: 3, kind: input, shape index: {}]   ;;  %s657_s4 = inlined_call_operand.vmem [shape: f32[1,128], index: 4, kind: input, shape index: {}]   ;;  %s658_s5 = inlined_call_operand.hbm [shape: f32[16,128], index: 5, kind: output, shape index: {}]  }
   0x1   :  { %11 = vsyncpa [#allocation6], 0 }
   0x2   :  { %12 = vsyncpa [#allocation4], 0  ;;  %s542_s18 = smov [#allocation5]   ;;  %s543_s20 = smov [#allocation2]  }
   0x3   :  { %s30_s19 = sshll.u32 %s542_s18, 4  ;;  %s18_s21 = sshll.u32 %s543_s20, 4  ;;  %s31_s19 = int_to_ptr.vmem [resolvable:$true] %s30_s19  ;;  %s578_s21 = int_to_ptr.vmem [resolvable:$true] %s18_s21 }
   0x4   :  { %s448_s24 = scalar_lea.hbm %s654_s1, 512 }
   0x5   :  { %p449_p0 = scmp.ne.s32.totalorder %s654_s1, %s448_s24  ;;  %p452_p1 = scmp.lt.u32.totalorder %s448_s24, %s654_s1 }
   0x7   :  { %p454_p2 = pnand %p452_p1, %p449_p0 }
   0x9   :  { %457 = shalt.err (!%p454_p2)
}
   0xa   :  { %s458_s29 = scalar_lea.vmem %s31_s19, 512  ;;  %p463_p4 = scmp.lt.s32.totalorder %s31_s19, %s31_s19 }
   0xb   :  { %p459_p3 = scmp.ne.s32.totalorder %s31_s19, %s458_s29  ;;  %p464_p5 = scmp.lt.s32.totalorder %s458_s29, %s458_s29 }
   0xd   :  { %p465_p6 = por %p464_p5, %p463_p4 }
   0xf   :  { %p466_p7 = pnand %p465_p6, %p459_p3 }
  0x11   :  { %469 = shalt.err (!%p466_p7)
}
  0x12   :  { %s544_s30 = smov 128   ;;  %s545_s6 = smov 8  }
  0x13   :  { %36 = dma.hbm_to_vmem [thread:$0]  %s654_s1, 512, %s31_s19, [#allocation6], %s544_s30, %s544_s30, %s545_s6  }
  0x14   :  { %s470_s11 = scalar_lea.hbm %s653_s0, 256 }
  0x15   :  { %p471_p8 = scmp.ne.s32.totalorder %s653_s0, %s470_s11  ;;  %p474_p9 = scmp.lt.u32.totalorder %s470_s11, %s653_s0 }
  0x17   :  { %p476_p10 = pnand %p474_p9, %p471_p8 }
  0x19   :  { %479 = shalt.err (!%p476_p10)
}
  0x1a   :  { %s480_s16 = scalar_lea.vmem %s578_s21, 256  ;;  %p485_p12 = scmp.lt.s32.totalorder %s578_s21, %s578_s21 }
  0x1b   :  { %p481_p11 = scmp.ne.s32.totalorder %s578_s21, %s480_s16  ;;  %p486_p13 = scmp.lt.s32.totalorder %s480_s16, %s480_s16 }
  0x1d   :  { %p487_p0 = por %p486_p13, %p485_p12 }
  0x1f   :  { %p488_p1 = pnand %p487_p0, %p481_p11 }
  0x21   :  { %491 = shalt.err (!%p488_p1)
}
  0x22   :  { %24 = dma.hbm_to_vmem [thread:$0]  %s653_s0, 256, %s578_s21, [#allocation3], %s544_s30, %s544_s30, %s545_s6  }
  0x23   :  { %s546_s18 = smov [#allocation7]   ;;  %s492_s23 = scalar_lea.hbm %s655_s2, 2048 }
  0x24   :  { %s42_s19 = sshll.u32 %s546_s18, 4  ;;  %p493_p2 = scmp.ne.s32.totalorder %s655_s2, %s492_s23  ;;  %s43_s19 = int_to_ptr.vmem [resolvable:$true] %s42_s19 }
  0x25   :  { %p496_p3 = scmp.lt.u32.totalorder %s492_s23, %s655_s2 }
  0x27   :  { %p498_p4 = pnand %p496_p3, %p493_p2 }
  0x29   :  { %501 = shalt.err (!%p498_p4)
}
  0x2a   :  { %s502_s28 = scalar_lea.vmem %s43_s19, 2048  ;;  %p507_p6 = scmp.lt.s32.totalorder %s43_s19, %s43_s19 }
  0x2b   :  { %p503_p5 = scmp.ne.s32.totalorder %s43_s19, %s502_s28  ;;  %p508_p7 = scmp.lt.s32.totalorder %s502_s28, %s502_s28 }
  0x2d   :  { %p509_p8 = por %p508_p7, %p507_p6 }
  0x2f   :  { %p510_p9 = pnand %p509_p8, %p503_p5 }
  0x31   :  { %513 = shalt.err (!%p510_p9)
}
  0x32   :  { %48 = dma.hbm_to_vmem [thread:$0]  %s655_s2, 2048, %s43_s19, [#allocation6], %s544_s30, %s544_s30, %s545_s6  }
  0x33   :  { %536 = dma.done.wait [#allocation3], 256  }
  0x34   :  { %537 = vsyncadd [#allocation3], 4294967040 }
  0x35   :  { %538 = dma.done.wait [#allocation6], 2560  }
  0x36   :  { %539 = vsyncadd [#allocation6], 4294964736  ;;  %vm68_vm0 = vcmask 261120   ;;  %v64_v0 = vld [vmem:[#allocation5] sm:$0xff]  ;;  %v65_v1 = vld [vmem:[#allocation5 + $0x8] sm:$0xff]  ;;  %v261_v48 = vlaneseq  ;;  %s547_s9 = smov [#allocation8]  }
  0x37   :  { %v66_v2 = vld [vmem:[#allocation5 + $0x10] sm:$0xff]  ;;  %v394_v3 = vpack.c.bf16 %v65_v1, %v64_v0  ;;  %v67_v4 = vld [vmem:[#allocation5 + $0x18] sm:$0xff]  ;;  %v160_v7 = vld [vmem:[#allocation7] sm:$0xff]  ;;  %s307_s10 = sshll.u32 %s547_s9, 4  ;;  %s308_s10 = int_to_ptr.vmem [resolvable:$true] %s307_s10 }
  0x38   :  { %v62_v5 = vld [vmem:[#allocation2] sm:$0xff]  ;;  %v398_v6 = vpack.c.bf16 %v67_v4, %v66_v2  ;;  %v161_v8 = vld [vmem:[#allocation7 + $0x8] sm:$0xff]  ;;  %v163_v11 = vld [vmem:[#allocation7 + $0x18] sm:$0xff]  ;;  %v262_v49 = vand.u32 127, %v261_v48  ;;  %s514_s11 = scalar_lea.vmem %s308_s10, 256  ;;  %p519_p11 = scmp.lt.s32.totalorder %s308_s10, %s308_s10 }
  0x39   :  { %356 = vmatprep.mubr.msk.f32.mxu0 %vm68_vm0, %v62_v5  ;;  %v162_v9 = vld [vmem:[#allocation7 + $0x10] sm:$0xff]  ;;  %395 = vmatprep.subr.bf16.mxu0 %v394_v3  ;;  %v402_v10 = vpack.c.bf16 %v161_v8, %v160_v7  ;;  %v164_v13 = vld [vmem:[#allocation7 + $0x20] sm:$0xff]  ;;  %v165_v14 = vld [vmem:[#allocation7 + $0x28] sm:$0xff]  ;;  %p515_p10 = scmp.ne.s32.totalorder %s308_s10, %s514_s11  ;;  %p520_p12 = scmp.lt.s32.totalorder %s514_s11, %s514_s11 }
  0x3a   :  { %397 = vmatpush3.bf16.msra.mxu0 %v394_v3  ;;  %v406_v12 = vpack.c.bf16 %v163_v11, %v162_v9  ;;  %v410_v15 = vpack.c.bf16 %v165_v14, %v164_v13  ;;  %v63_v16 = vld [vmem:[#allocation2 + $0x8] sm:$0xff]  ;;  %v166_v17 = vld [vmem:[#allocation7 + $0x30] sm:$0xff]  ;;  %v168_v20 = vld [vmem:[#allocation7 + $0x40] sm:$0xff]  ;;  %vm263_vm1 = vcmp.lt.s32.totalorder %v262_v49, 64 }
  0x3b   :  { %399 = vmatprep.subr.bf16.mxu0 %v398_v6  ;;  %403 = vmatprep.subr.bf16.mxu1 %v402_v10  ;;  %v167_v18 = vld [vmem:[#allocation7 + $0x38] sm:$0xff]  ;;  %v169_v21 = vld [vmem:[#allocation7 + $0x48] sm:$0xff]  ;;  %v170_v23 = vld [vmem:[#allocation7 + $0x50] sm:$0xff]  ;;  %p521_p13 = por %p520_p12, %p519_p11 }
  0x3c   :  { %405 = vmatpush3.bf16.msra.mxu1 %v402_v10  ;;  %v414_v19 = vpack.c.bf16 %v167_v18, %v166_v17  ;;  %v418_v22 = vpack.c.bf16 %v169_v21, %v168_v20  ;;  %v171_v24 = vld [vmem:[#allocation7 + $0x58] sm:$0xff]  ;;  %v172_v25 = vld [vmem:[#allocation7 + $0x60] sm:$0xff]  ;;  %v173_v27 = vld [vmem:[#allocation7 + $0x68] sm:$0xff] }
  0x3d   :  { %407 = vmatprep.subr.bf16.mxu1 %v406_v12  ;;  %v422_v26 = vpack.c.bf16 %v171_v24, %v170_v23  ;;  %v426_v28 = vpack.c.bf16 %v173_v27, %v172_v25  ;;  %v174_v29 = vld [vmem:[#allocation7 + $0x70] sm:$0xff]  ;;  %v175_v30 = vld [vmem:[#allocation7 + $0x78] sm:$0xff]  ;;  %p522_p0 = pnand %p521_p13, %p515_p10 }
  0x3e   :  { %401 = vmatpush3.bf16.msra.mxu0 %v398_v6  ;;  %v430_v31 = vpack.c.bf16 %v175_v30, %v174_v29  ;;  %v322_v3 = vld [vmem:[%s656_s3] ss:$0 sm:$0xff] }
  0x3f   :  { %v323_v5 = vld [vmem:[%s657_s4] ss:$0 sm:$0xff] }
  0x40   :  { %409 = vmatpush3.bf16.msra.mxu1 %v406_v12 }
  0x41   :  { %357 = vmatmul.mubr.msk.f32.vlgmr.msra.gmra.mrb[0].mxu0 %vm68_vm0, %v63_v16  ;;  %411 = vmatprep.subr.bf16.mxu1 %v410_v15 }
  0x44   :  { %413 = vmatpush3.bf16.msra.mxu1 %v410_v15 }
  0x45   :  { %415 = vmatprep.subr.bf16.mxu1 %v414_v19 }
  0x48   :  { %417 = vmatpush3.bf16.msra.mxu1 %v414_v19 }
  0x49   :  { %419 = vmatprep.subr.bf16.mxu1 %v418_v22 }
  0x4c   :  { %421 = vmatpush3.bf16.msra.mxu1 %v418_v22 }
  0x4d   :  { %423 = vmatprep.subr.bf16.mxu1 %v422_v26 }
  0x50   :  { %425 = vmatpush3.bf16.msra.mxu1 %v422_v26 }
  0x51   :  { %427 = vmatprep.subr.bf16.mxu1 %v426_v28 }
  0x54   :  { %429 = vmatpush3.bf16.msra.mxu1 %v426_v28 }
  0x55   :  { %431 = vmatprep.subr.bf16.mxu1 %v430_v31 }
  0x58   :  { %433 = vmatpush3.bf16.msra.mxu1 %v430_v31 }
 0x114   :  { %v358_v32 = vpop.f32.mrb[0].mxu0 }
 0x115   :  { %v153_v33 = vmul.f32 0.70710677, %v358_v32  ;;  %v141_v34 = vpop.f32.mrb[1].mxu0  ;;  %v151_v41 = vmul.f32 0.5, %v358_v32 }
 0x116   :  { %v152_v35 = vmul.f32 0.70710677, %v141_v34  ;;  %v150_v39 = vmul.f32 0.5, %v141_v34 }
 0x117   :  { %440 = verf.f32 %v153_v33 }
 0x118   :  { %442 = verf.f32 %v152_v35 }
 0x121   :  { %v441_v36 = vpop.eup %440 }
 0x122   :  { %v443_v37 = vpop.eup %442  ;;  %v157_v38 = vadd.f32 1.0, %v441_v36 }
 0x123   :  { %v156_v40 = vadd.f32 1.0, %v443_v37 }
 0x124   :  { %v159_v43 = vmul.f32 %v157_v38, %v151_v41 }
 0x125   :  { %v158_v42 = vmul.f32 %v156_v40, %v150_v39 }
 0x127   :  { %391 = vmatprep.mubr.f32.mxu1 %v158_v42 }
 0x128   :  { %392 = vmatmul.mubr.f32.vlgmr.msra.gmra.mrb[0].mxu1 %v159_v43 }
 0x1fb   :  { %v393_v44 = vpop.f32.mrb[0].mxu1 }
 0x1fc   :  { %v252_v45 = vadd.f32 %v393_v44, %v358_v32  ;;  %v242_v46 = vpop.f32.mrb[1].mxu1 }
 0x1fd   :  { %v251_v47 = vadd.f32 %v242_v46, %v141_v34 }
 0x1ff   :  { %253 = vadd.xlane.f32.xlu0 %v251_v47 }
 0x203   :  { %255 = vadd.xlane.f32.xlu0 %v252_v45 }
 0x28c   :  { %v254_v50 = vpop.xlane.xlu0 %253 }
 0x28d   :  { %v257_v51 = vmul.f32 0.015625, %v254_v50 }
 0x28f   :  { %v259_v52 = vsub.f32 %v251_v47, %v257_v51 }
 0x290   :  { %v256_v53 = vpop.xlane.xlu0 %255 }
 0x291   :  { %v258_v54 = vmul.f32 0.015625, %v256_v53  ;;  %v266_v55 = vsel %vm263_vm1, %v259_v52, 0.0 }
 0x292   :  { %v268_v56 = vmul.f32 %v266_v55, %v266_v55 }
 0x293   :  { %v260_v57 = vsub.f32 %v252_v45, %v258_v54 }
 0x294   :  { %270 = vadd.xlane.f32.xlu1 %v268_v56 }
 0x295   :  { %v267_v58 = vsel %vm263_vm1, %v260_v57, 0.0 }
 0x296   :  { %v269_v59 = vmul.f32 %v267_v58, %v267_v58 }
 0x298   :  { %272 = vadd.xlane.f32.xlu1 %v269_v59 }
 0x321   :  { %v271_v60 = vpop.xlane.xlu1 %270 }
 0x322   :  { %v274_v61 = vmul.f32 0.015625, %v271_v60 }
 0x324   :  { %v276_v62 = vadd.f32 1e-05, %v274_v61 }
 0x325   :  { %v273_v63 = vpop.xlane.xlu1 %272 }
 0x326   :  { %444 = vrsqrt.f32 %v276_v62  ;;  %v275_v0 = vmul.f32 0.015625, %v273_v63 }
 0x328   :  { %v277_v1 = vadd.f32 1e-05, %v275_v0 }
 0x32a   :  { %446 = vrsqrt.f32 %v277_v1 }
 0x330   :  { %v445_v2 = vpop.eup %444 }
 0x331   :  { %v280_v4 = vmul.f32 %v445_v2, %v266_v55 }
 0x333   :  { %v289_v6 = vmul.f32 %v322_v3, %v280_v4 }
 0x334   :  { %v447_v7 = vpop.eup %446 }
 0x335   :  { %v281_v8 = vmul.f32 %v447_v7, %v267_v58  ;;  %v298_v9 = vadd.f32 %v323_v5, %v289_v6 }
 0x337   :  { %v290_v10 = vmul.f32 %v322_v3, %v281_v8  ;;  %300 = vst [vmem:[#allocation8] sm:$0xff] %v298_v9 }
 0x339   :  { %v299_v11 = vadd.f32 %v323_v5, %v290_v10 }
 0x33b   :  { %301 = vst [vmem:[#allocation8 + $0x8] sm:$0xff] %v299_v11 }
 0x33c   :  { %525 = shalt.err (!%p522_p0)
}
 0x33d   :  { %s526_s12 = scalar_lea.hbm %s658_s5, 256 }
 0x33e   :  { %p527_p1 = scmp.ne.s32.totalorder %s658_s5, %s526_s12  ;;  %p530_p2 = scmp.lt.u32.totalorder %s526_s12, %s658_s5 }
 0x340   :  { %p532_p3 = pnand %p530_p2, %p527_p1 }
 0x342   :  { %535 = shalt.err (!%p532_p3)
}
 0x343   :  { %313 = dma.vmem_to_hbm [thread:$0]  %s308_s10, 256, %s658_s5, [#allocation4], %s544_s30, %s544_s30, %s545_s6  }
 0x344   :  { %540 = dma.done.wait [#allocation4], 256  }
 0x345   :  { %541 = vsyncadd [#allocation4], 4294967040 }
 0x346   :  { %317 = vsyncpa [#allocation3], 1 }
 0x347   :  { %318 = vsyncpa [#allocation6], 1 }
 0x348   :  { %319 = vsyncpa [#allocation4], 1 }

</bundles_post_ra>
